<compile_context>
chip_gen: v6e
topology: v6e:2x2x1
jax: 0.10.0
libtpu: 0.0.40
codegen_flags: <defaults>
</compile_context>

<pallas_src>
import jax
import jax.numpy as jnp
from jax.experimental import pallas as pl
from jax.experimental.pallas import tpu as pltpu


def _dma_copy_kernel(x_hbm_ref, o_hbm_ref, sem):
    # Single whole-array HBM->HBM DMA; the TensorCore only issues the
    # descriptor and waits on the semaphore.
    copy = pltpu.make_async_copy(x_hbm_ref, o_hbm_ref, sem)
    copy.start()
    copy.wait()


def flatten(x, *, materialize=False):
    """Pallas equivalent of Flatten.forward: (B, ...) -> (B, prod(rest)).

    materialize=False (default): metadata-only reshape, no kernel launched.
    materialize=True: force a fresh buffer via a direct HBM->HBM DMA kernel.
    """
    B = x.shape[0]
    F_ = 1
    for d in x.shape[1:]:
        F_ *= d

    # Metadata-only reshape in the wrapper (matches torch .view on a
    # contiguous tensor) — free in XLA.
    x2 = x.reshape(B, F_)

    if not materialize:
        return x2

    itemsize = jnp.dtype(x.dtype).itemsize
    return pl.pallas_call(
        _dma_copy_kernel,
        out_shape=jax.ShapeDtypeStruct((B, F_), x.dtype),
        in_specs=[pl.BlockSpec(memory_space=pl.ANY)],
        out_specs=pl.BlockSpec(memory_space=pl.ANY),
        scratch_shapes=[pltpu.SemaphoreType.DMA],
        cost_estimate=pl.CostEstimate(
            flops=0,
            transcendentals=0,
            bytes_accessed=2 * B * F_ * itemsize,
        ),
    )(x2)


if __name__ == "__main__":
    key = jax.random.PRNGKey(0)
    # Small NCHW input consistent with a conv feature map feeding Flatten.
    B, C, H, W = 2, 4, 16, 16
    x = jax.random.normal(key, (B, C, H, W), dtype=jnp.float32)

    ref = x.reshape(B, C * H * W)

    # Default (no-kernel) fast path.
    out_fast = jax.block_until_ready(flatten(x))
    assert out_fast.shape == (B, C * H * W), out_fast.shape
    assert out_fast.dtype == x.dtype
    assert bool(jnp.array_equal(out_fast, ref)), "flatten (fast path) mismatch"

    # Forced-materialization path: single HBM->HBM DMA Pallas kernel.
    out_kernel = jax.block_until_ready(flatten(x, materialize=True))
    assert out_kernel.shape == (B, C * H * W), out_kernel.shape
    assert out_kernel.dtype == x.dtype
    assert bool(jnp.array_equal(out_kernel, ref)), "flatten (DMA kernel) mismatch"

    print("KERNEL_OK")
</pallas_src>

<mosaic_0001>
module attributes {stable_mosaic.version = 11 : i64} {
  func.func @_dma_copy_kernel(%arg0: memref<2x1024xf32, #tpu.memory_space<any>>, %arg1: memref<2x1024xf32, #tpu.memory_space<any>>, %arg2: memref<!tpu.dma_semaphore, #tpu.memory_space<semaphore_mem>>) attributes {dimension_semantics = [], scalar_prefetch = 0 : i64, scratch_operands = 1 : i64, tpu.core_type = #tpu.core_type<tc>} {
    tpu.enqueue_dma source(%arg0 : memref<2x1024xf32, #tpu.memory_space<any>>) target(%arg1 : memref<2x1024xf32, #tpu.memory_space<any>>) target_semaphore(%arg2 : memref<!tpu.dma_semaphore, #tpu.memory_space<semaphore_mem>>)
    tpu.wait_dma2 semaphore(%arg2 : memref<!tpu.dma_semaphore, #tpu.memory_space<semaphore_mem>>) src(%arg0 : memref<2x1024xf32, #tpu.memory_space<any>>) dst(%arg1 : memref<2x1024xf32, #tpu.memory_space<any>>)
    return
  }
}

</mosaic_0001>

<bundles_post_ra>
// kernel: tpu_custom_call.1
= control target key start
LH: loop header
LB: loop body
LE: loop exit
PB: predicated region body
PF: predicated region fallthrough
CT: control target
= control target key end

     0   :  { %s29_s6 = smov [#allocation2]   ;;  %s30_s7 = smov 131072   ;;  %s48_s0 = inlined_call_operand.hbm [shape: f32[2,1024], index: 0, kind: input, shape index: {}]   ;;  %s49_s1 = inlined_call_operand.hbm [shape: f32[2,1024], index: 1, kind: output, shape index: {}]  }
   0x1   :  { %s31_s8 = smov 0  }
   0x2   :  { %12 = dma.general %s48_s0, 256, %s49_s1, %s29_s6, %s30_s7, [#allocation4], %s31_s8, 0  }
   0x3   :  { %27 = dma.done.wait [#allocation2], 256 }
   0x4   :  { %28 = vsyncadd [#allocation2], 4294967040 }
   0x5   :  { %17 = vsyncmov [#allocation2] }
   0x8   :  { %s18_s13 = vpop.sfrf %17 }
   0x9   :  { %p23_p0 = scmp.ne.s32.totalorder %s18_s13, 0 }
   0xb   :  { %22 = shalt.err (%p23_p0)  }

</bundles_post_ra>
